<compile_context>
chip_gen: v5e
topology: v5e:2x2
jax: 0.10.0
libtpu: 0.0.40
codegen_flags: <defaults>
</compile_context>

<pallas_src>
import functools
import math

import jax
import jax.numpy as jnp
from jax.experimental import pallas as pl
from jax.experimental.pallas import tpu as pltpu


def _roll_one_kernel(x_ref, o_ref, *, dr, s):
    """out[i, j] = x[(i - dr) % TH, (j - s) % WC] on one (TH, WC) tile.

    dr: in-tile row roll (0 when the H shift is already folded into the
        input BlockSpec index_map, or dh when TH == H).
    s:  lane shift = dw * C in the flattened lane-dense axis.
    """
    v = x_ref[...]
    if dr:
        v = pltpu.roll(v, shift=dr, axis=0)   # sublane roll (XLU)
    if s:
        v = pltpu.roll(v, shift=s, axis=1)    # lane roll (XLU)
    o_ref[...] = v


def _roll_two_kernel(a_ref, b_ref, o_ref, *, r, s):
    """Universal-tiling kernel (H shift not tile-aligned).

    Output tile rows [r:TH) come from tile A rows [0:TH-r); rows [0:r) come
    from tile B rows [TH-r:TH).  Implemented as two sublane rolls + a row
    select so the final store is a single full-width aligned vst, followed by
    one lane roll for the W shift.
    """
    th, wc = o_ref.shape
    a = pltpu.roll(a_ref[...], shift=r, axis=0)
    b = pltpu.roll(b_ref[...], shift=r, axis=0)
    rows = jax.lax.broadcasted_iota(jnp.int32, (th, wc), 0)
    v = jnp.where(rows < r, b, a)
    if s:
        v = pltpu.roll(v, shift=s, axis=1)
    o_ref[...] = v


def _target_block_bytes():
    """Per-generation block-size target (feedback items 2 & 8)."""
    try:
        cap = pltpu.get_tpu_info().vmem_capacity_bytes
    except Exception:
        return 2 << 20                      # conservative default
    if cap >= (100 << 20):                  # v5e / v6e: 128 MiB VMEM
        return 4 << 20
    return 3 << 19                          # v7x: 64 MiB VMEM -> ~1.5 MiB


def _pick_tile(H, WC, itemsize, target_block_bytes):
    """Largest H tile that divides H, respects dtype sublane packing and
    fits the block-byte target; H itself (full dim) is always legal."""
    sub = max(8, 32 // max(int(itemsize), 1))   # 8 f32, 16 bf16, 32 int8
    cands = [t for t in range(sub, H + 1, sub) if H % t == 0]
    if H not in cands:
        cands.append(H)                     # full extent is always allowed
    fitting = [t for t in cands if t * WC * itemsize <= target_block_bytes]
    return max(fitting) if fitting else min(cands)


def cyclic_shift(x, displacement, *, target_block_bytes=None):
    """Pallas TPU equivalent of CyclicShift(displacement)(x) for NHWC input.

    Matches torch.roll(x, shifts=(displacement, displacement), dims=(1, 2)).
    """
    B, H, W, C = x.shape
    dh = displacement % H                   # normalize (handles negatives)
    dw = displacement % W

    # Zero shift: don't launch a pure-copy kernel.
    if dh == 0 and dw == 0:
        return x

    WC = W * C
    s = dw * C
    itemsize = jnp.dtype(x.dtype).itemsize
    if target_block_bytes is None:
        target_block_bytes = _target_block_bytes()

    # Lane-dense view: fold (W, C) into one last axis (free reshape).
    x2 = x.reshape(B, H, WC)

    th = _pick_tile(H, WC, itemsize, target_block_bytes)
    nh = H // th
    q, r = divmod(dh, th)
    block_bytes = th * WC * itemsize

    grid = (B, nh)
    out_spec = pl.BlockSpec((None, th, WC), lambda b, h: (b, h, 0))
    off_a = (nh - (q % nh)) % nh            # source block for the bulk rows

    if r == 0 or nh == 1:
        # H shift either fully folded into the index_map (r == 0) or done
        # entirely in-register on the single full-H tile (nh == 1).
        dr = dh if nh == 1 else 0
        kernel = functools.partial(_roll_one_kernel, dr=dr, s=s)
        in_specs = [
            pl.BlockSpec((None, th, WC),
                         lambda b, h, _o=off_a, _n=nh: (b, (h + _o) % _n, 0)),
        ]
        operands = (x2,)
        n_specs = 2        # 1 in + 1 out
        read_mult = 1
    else:
        # Universal path: two in_specs (non-wrap / wrap row windows).
        off_b = (nh - ((q + 1) % nh)) % nh
        kernel = functools.partial(_roll_two_kernel, r=r, s=s)
        in_specs = [
            pl.BlockSpec((None, th, WC),
                         lambda b, h, _o=off_a, _n=nh: (b, (h + _o) % _n, 0)),
            pl.BlockSpec((None, th, WC),
                         lambda b, h, _o=off_b, _n=nh: (b, (h + _o) % _n, 0)),
        ]
        operands = (x2, x2)
        n_specs = 3        # 2 in + 1 out
        read_mult = 2

    total_bytes = B * H * WC * itemsize
    # Double-buffered blocks for every spec plus slack; ALWAYS set the limit
    # (v5e scoped default is only 16 MiB) and keep it under v7x's 64 MiB.
    needed_vmem = 2 * n_specs * block_bytes + (2 << 20)
    vmem_limit = min(max(needed_vmem, 32 << 20), 60 << 20)

    compiler_params = pltpu.CompilerParams(
        dimension_semantics=("parallel", "parallel"),
        vmem_limit_bytes=vmem_limit,
    )

    out2 = pl.pallas_call(
        kernel,
        out_shape=jax.ShapeDtypeStruct((B, H, WC), x.dtype),
        grid_spec=pltpu.PrefetchScalarGridSpec(
            num_scalar_prefetch=0,
            grid=grid,
            in_specs=in_specs,
            out_specs=out_spec,
        ),
        compiler_params=compiler_params,
        cost_estimate=pl.CostEstimate(
            flops=0, transcendentals=0,
            bytes_accessed=(1 + read_mult) * total_bytes),
    )(*operands)

    return out2.reshape(B, H, W, C)


if __name__ == "__main__":
    key = jax.random.PRNGKey(0)
    B, H, W, C = 2, 16, 16, 32
    x = jax.random.normal(key, (B, H, W, C), dtype=jnp.float32)

    def check(out, d, msg):
        ref = jnp.roll(x, shift=(d, d), axis=(1, 2))
        assert out.shape == x.shape and out.dtype == x.dtype
        assert jnp.array_equal(out, ref), msg

    # (a) default tiling (TH == H here): single-tile in-register H+W roll.
    d = 4
    check(jax.block_until_ready(cyclic_shift(x, d)), d, "single-tile path")

    # (b) forced small tile, dh % TH == 0: H shift folded into the index_map.
    d = 8
    out = jax.block_until_ready(cyclic_shift(x, d, target_block_bytes=16 << 10))
    check(out, d, "aligned index_map path")

    # (c) forced small tile, dh % TH != 0 and s % 128 != 0: universal two-spec
    #     path with misaligned lane roll (typical Swin d = window // 2 = 3).
    d = 3
    out = jax.block_until_ready(cyclic_shift(x, d, target_block_bytes=16 << 10))
    check(out, d, "universal two-spec path")

    # (d) negative displacement on the universal path.
    d = -5
    out = jax.block_until_ready(cyclic_shift(x, d, target_block_bytes=16 << 10))
    check(out, d, "negative displacement")

    # (e) zero shift short-circuits (no kernel launch).
    out = jax.block_until_ready(cyclic_shift(x, 0))
    assert jnp.array_equal(out, x)

    # (f) bf16 input: sublane-packing-aware tile selection + packed rolls.
    xb = x.astype(jnp.bfloat16)
    d = 6
    outb = jax.block_until_ready(cyclic_shift(xb, d))
    refb = jnp.roll(xb, shift=(d, d), axis=(1, 2))
    assert outb.dtype == jnp.bfloat16 and jnp.array_equal(outb, refb), "bf16 path"

    print("KERNEL_OK")
</pallas_src>

<mosaic_0001>
module attributes {stable_mosaic.version = 11 : i64} {
  func.func @_roll_one_kernel(%arg0: i32, %arg1: i32, %arg2: memref<1x16x512xf32, #tpu.memory_space<vmem>>, %arg3: memref<1x16x512xf32, #tpu.memory_space<vmem>>) attributes {dimension_semantics = [#tpu.dimension_semantics<parallel>, #tpu.dimension_semantics<parallel>], iteration_bounds = array<i64: 2, 1>, scalar_prefetch = 0 : i64, scratch_operands = 0 : i64, tpu.core_type = #tpu.core_type<tc>, window_params = [{transform_indices = @transform_0, window_bounds = array<i64: 1, 16, 512>}, {transform_indices = @transform_1, window_bounds = array<i64: 1, 16, 512>}]} {
    %c0 = arith.constant 0 : index
    %c0_0 = arith.constant 0 : index
    %c0_1 = arith.constant 0 : index
    %0 = vector.load %arg2[%c0, %c0_0, %c0_1] : memref<1x16x512xf32, #tpu.memory_space<vmem>>, vector<1x16x512xf32>
    %1 = vector.shape_cast %0 : vector<1x16x512xf32> to vector<16x512xf32>
    %c4_i32 = arith.constant 4 : i32
    %2 = tpu.dynamic_rotate %1 by %c4_i32 dim 0 : vector<16x512xf32>, i32 -> vector<16x512xf32>
    %c128_i32 = arith.constant 128 : i32
    %3 = tpu.dynamic_rotate %2 by %c128_i32 dim 1 : vector<16x512xf32>, i32 -> vector<16x512xf32>
    %c0_2 = arith.constant 0 : index
    %c0_3 = arith.constant 0 : index
    %c0_4 = arith.constant 0 : index
    %4 = vector.load %arg3[%c0_2, %c0_3, %c0_4] : memref<1x16x512xf32, #tpu.memory_space<vmem>>, vector<1x16x512xf32>
    %5 = vector.shape_cast %4 : vector<1x16x512xf32> to vector<16x512xf32>
    %6 = vector.shape_cast %3 : vector<16x512xf32> to vector<1x16x512xf32>
    tpu.vector_store %arg3[%c0_2, %c0_3, %c0_4], %6 {strides = array<i32>} : memref<1x16x512xf32, #tpu.memory_space<vmem>>, vector<1x16x512xf32>,
    return
  }
  func.func @transform_0(%arg0: i32, %arg1: i32) -> (i32, i32, i32) {
    %c0_i32 = arith.constant 0 : i32
    %0 = arith.addi %arg1, %c0_i32 : i32
    %c1_i32 = arith.constant 1 : i32
    %c0_i32_0 = arith.constant 0 : i32
    %1 = arith.cmpi eq, %c1_i32, %c0_i32_0 : i32
    %c1_i32_1 = arith.constant 1 : i32
    %2 = arith.select %1, %c1_i32_1, %c1_i32 : i32
    %3 = arith.remsi %0, %2 : i32
    %c0_i32_2 = arith.constant 0 : i32
    %4 = arith.cmpi ne, %3, %c0_i32_2 : i32
    %c0_i32_3 = arith.constant 0 : i32
    %5 = arith.cmpi slt, %3, %c0_i32_3 : i32
    %c0_i32_4 = arith.constant 0 : i32
    %6 = arith.cmpi slt, %2, %c0_i32_4 : i32
    %7 = arith.xori %5, %6 : i1
    %8 = arith.andi %7, %4 : i1
    %9 = arith.addi %3, %2 : i32
    %10 = arith.select %8, %9, %3 : i32
    %c0_i32_5 = arith.constant 0 : i32
    %c0_i32_6 = arith.constant 0 : i32
    return %arg0, %10, %c0_i32_5 : i32, i32, i32
  }
  func.func @transform_1(%arg0: i32, %arg1: i32) -> (i32, i32, i32) {
    %c0_i32 = arith.constant 0 : i32
    %c0_i32_0 = arith.constant 0 : i32
    return %arg0, %arg1, %c0_i32 : i32, i32, i32
  }
}

</mosaic_0001>

<bundles_post_ra>
// kernel: tpu_custom_call.1
= control target key start
LH: loop header
LB: loop body
LE: loop exit
PB: predicated region body
PF: predicated region fallthrough
CT: control target
= control target key end

     0   :  { %6 = vsyncpa [#allocation3], 0  ;;  %s629_s0 = inlined_call_operand.hbm [shape: f32[2,16,512], index: 0, kind: input, shape index: {}]   ;;  %s630_s1 = inlined_call_operand.hbm [shape: f32[2,16,512], index: 1, kind: output, shape index: {}]  }
   0x1   :  { %8 = vsyncpa [#allocation3 + $0x1], 0 }
   0x2   :  { %9 = vsyncpa [#allocation4], 0 }
   0x3   :  { %11 = vsyncpa [#allocation4 + $0x1], 0  ;;  %s501_s6 = smov 0   ;;  %s503_s7 = smov 0  }
   0x4   :  { %s505_s8 = smov 0   ;;  %s507_s9 = smov 0  }
   0x5   :  { %s509_s10 = smov 0   ;;  %s511_s11 = smov 0  }
   0x6 LB: > { %s290_s12 = sadd.s32 4294967295, %s485_s11   ;;  %s291_s13 = sadd.s32 4294967294, %s485_s11   ;;  %s485_s11 = sphi %s511_s11, %s17_s11   ;;  %s481_s10 = sphi %s509_s10, %s639_s10   ;;  %s477_s9 = sphi %s507_s9, %s638_s9   ;;  %s473_s8 = sphi %s505_s8, %s637_s8   ;;  %s469_s7 = sphi %s503_s7, %s636_s7   ;;  %s465_s6 = sphi %s501_s6, %s635_s6  }
   0x7   : > { %s29_s14 = sadd.s32 1, %s481_s10  ;;  %s36_s15 = sadd.s32 1, %s473_s8 }
   0x8   : > { %p31_p0 = scmp.ge.s32.totalorder %s29_s14, 2  ;;  %p43_p1 = scmp.ne.s32.totalorder %s473_s8, %s469_s7 }
   0x9   : > { %p44_p2 = scmp.eq.s32.totalorder %s485_s11, 0  ;;  %p49_p3 = scmp.ne.s32.totalorder %s469_s7, %s465_s6 }
   0xa   : > { %s641_s14 = smov (%p31_p0, %s29_s14), 0  ;;  %p50_p5 = scmp.eq.s32.totalorder %s290_s12, 0 }
   0xb   : > { %p542_p4 = por %p44_p2, %p43_p1  ;;  %s33_s17 = ssub.s32 %s481_s10, %s641_s14 }
   0xc   : > { %p75_p6 = scmp.eq.s32.totalorder %s290_s12, 1  ;;  %p34_p7 = scmp.eq.s32.totalorder %s33_s17, 0 }
   0xd   : > { %p548_p8 = por %p50_p5, %p49_p3  ;;  %p81_p10 = scmp.eq.s32.totalorder %s291_s13, 1 }
   0xe   : > { %p552_p9 = por %p75_p6, %p43_p1  ;;  %p293_p12 = scmp.ge.s32.totalorder %s485_s11, 2 }
   0xf   : > { %s557_s20 = scalar_select %p34_p7, %s473_s8, %s36_s15  }
  0x10   : > { %p559_p11 = por %p81_p10, %p49_p3  ;;  %p319_p13 = scmp.lt.s32.totalorder %s485_s11, 2 }
  0x11   : > { %s101_s22 = sand.u32 1, %s473_s8   ;;  %s305_s24 = sshll.u32 %s481_s10, 6 }
  0x12   : > { %s294_s23 = sshll.u32 %s101_s22, 6  ;;  %s110_s27 = scalar_lea.hbm %s629_s0, %s305_s24 }
  0x13   : > { %s105_s28 = scalar_lea.vmem [#allocation2], %s294_s23  ;;  %s111_s30 = sshll.u32 %s110_s27, 4  ;;  %s112_s30 = int_to_ptr.hbm [resolvable:$true] %s111_s30 }
  0x14   : > { %s113_s29 = sshll.u32 %s105_s28, 4  ;;  %p312_p0 = pnand %p319_p13, %p542_p4  ;;  %s114_s29 = int_to_ptr.vmem [resolvable:$true] %s113_s29 }
  0x15   : > { %p297_p1 = scmp.ge.s32.totalorder %s485_s11, 1  ;;  %s102_s2 = scalar_lea.sflag [#allocation3], %s101_s22 }
  0x16   : > { %s487_s3 = smov 512   ;;  %s488_s4 = smov 32  }
  0x17   : > { %314 = dma.hbm_to_vmem [thread:$0]  (!%p312_p0), %s112_s30, 1024, %s114_s29, %s102_s2, %s487_s3, %s487_s3, %s488_s4  }
  0x18   : > { %p121_p2 = scmp.lt.s32.totalorder %s485_s11, 3 }
  0x1a   : > { %p122_p3 = pnand %p297_p1, %p121_p2 }
  0x1b   : > { %s575_s5 = sand.u32 (!%p122_p3), 1, %s469_s7  }
  0x1c   : > { %125 = sbr.rel (%p122_p3) target bundleno = 51 (0x33), region = 24  ;;  %s298_s12 = sshll.u32 (!%p122_p3), %s575_s5, 6 }
  0x1d   : > { %s128_s13 = scalar_lea.sflag (!%p122_p3), [#allocation3], %s575_s5  ;;  %s131_s15 = scalar_lea.vmem (!%p122_p3), [#allocation2], %s298_s12 }
  0x21   : > { %456 = dma.done.wait (%p548_p8), %s128_s13, 1024  }
  0x22   : > { %458 = vsyncadd (%p548_p8), %s128_s13, 4294966272  ;;  %v168_v0 = vlaneseq  ;;  %v155_v2 = vld [vmem:[%s131_s15 + $0x18] sm:$0xff]  ;;  %v152_v4 = vld [vmem:[%s131_s15] sm:$0xff]  ;;  %s306_s16 = sshll.u32 %s477_s9, 6  ;;  %s150_s9 = scalar_lea.vmem [#allocation5], %s298_s12 }
  0x23   : > { %v159_v3 = vld [vmem:[%s131_s15 + $0x38] sm:$0xff]  ;;  %v163_v5 = vrot.slane %v155_v2, 4  ;;  %v156_v7 = vld [vmem:[%s131_s15 + $0x20] sm:$0xff]  ;;  %v160_v8 = vrot.slane %v152_v4, 4  ;;  %v153_v9 = vld [vmem:[%s131_s15 + $0x8] sm:$0xff]  ;;  %s202_s22 = scalar_lea.hbm %s630_s1, %s306_s16  ;;  %s203_s23 = sshll.u32 %s150_s9, 4  ;;  %s204_s23 = int_to_ptr.vmem [resolvable:$true] %s203_s23 }
  0x24   : > { %v169_v1 = vshrl.u32 %v168_v0, 7  ;;  %v167_v6 = vrot.slane %v159_v3, 4  ;;  %v157_v10 = vld [vmem:[%s131_s15 + $0x28] sm:$0xff]  ;;  %v164_v11 = vrot.slane %v156_v7, 4  ;;  %v161_v12 = vrot.slane %v153_v9, 4  ;;  %v154_v14 = vld [vmem:[%s131_s15 + $0x10] sm:$0xff] }
  0x25   : > { %v165_v13 = vrot.slane %v157_v10, 4  ;;  %v158_v15 = vld [vmem:[%s131_s15 + $0x30] sm:$0xff]  ;;  %v162_v17 = vrot.slane %v154_v14, 4  ;;  %s205_s24 = sshll.u32 %s202_s22, 4  ;;  %s188_s25 = scalar_lea.sflag [#allocation4], %s575_s5  ;;  %s206_s24 = int_to_ptr.hbm [resolvable:$true] %s205_s24 }
  0x26   : > { %vm170_vm0 = vcmp.lt.s32.totalorder %v169_v1, 4  ;;  %v166_v18 = vrot.slane %v158_v15, 4  ;;  %s417_s26 = sshra.s32 %s206_s24, 4  ;;  %s423_s30 = scalar_lea.hbm %s630_s1, 128  ;;  %s418_s26 = int_to_ptr.hbm [resolvable:$true] %s417_s26 }
  0x27   : > { %v178_v16 = vsel %vm170_vm0, %v167_v6, %v163_v5  ;;  %v175_v19 = vsel %vm170_vm0, %v164_v11, %v160_v8  ;;  %v176_v20 = vsel %vm170_vm0, %v165_v13, %v161_v12  ;;  %v174_v22 = vsel %vm170_vm0, %v163_v5, %v167_v6  ;;  %s419_s27 = scalar_lea.hbm %s418_s26, 64  ;;  %p424_p7 = scmp.lt.s32.totalorder %s418_s26, %s630_s1 }
  0x28   : > { %179 = vst [vmem:[%s150_s9] sm:$0xff] %v178_v16  ;;  %v177_v21 = vsel %vm170_vm0, %v166_v18, %v162_v17  ;;  %v171_v23 = vsel %vm170_vm0, %v160_v8, %v164_v11  ;;  %v172_v24 = vsel %vm170_vm0, %v161_v12, %v165_v13  ;;  %v173_v25 = vsel %vm170_vm0, %v162_v17, %v166_v18  ;;  %p420_p4 = scmp.ne.s32.totalorder %s418_s26, %s419_s27  ;;  %p425_p8 = scmp.lt.s32.totalorder %s423_s30, %s419_s27 }
  0x29   : > { %180 = vst [vmem:[%s150_s9 + $0x8] sm:$0xff] %v175_v19 }
  0x2a   : > { %181 = vst [vmem:[%s150_s9 + $0x10] sm:$0xff] %v176_v20  ;;  %p421_p5 = pnand %p420_p4, %p552_p9  ;;  %p426_p10 = por %p425_p8, %p424_p7 }
  0x2b   : > { %182 = vst [vmem:[%s150_s9 + $0x18] sm:$0xff] %v177_v21 }
  0x2c   : > { %183 = vst [vmem:[%s150_s9 + $0x20] sm:$0xff] %v174_v22  ;;  %p422_p6 = pneg %p421_p5 }
  0x2d   : > { %184 = vst [vmem:[%s150_s9 + $0x28] sm:$0xff] %v171_v23 }
  0x2e   : > { %185 = vst [vmem:[%s150_s9 + $0x30] sm:$0xff] %v172_v24  ;;  %p427_p13 = pnand %p426_p10, %p422_p6 }
  0x2f   : > { %186 = vst [vmem:[%s150_s9 + $0x38] sm:$0xff] %v173_v25 }
  0x30   : > { %430 = shalt.err (!%p427_p13)
}
  0x31   : > { %s489_s4 = smov 512   ;;  %s490_s5 = smov 32  }
  0x32   : > { %309 = dma.vmem_to_hbm [thread:$0]  (%p552_p9), %s204_s23, 1024, %s206_s24, %s188_s25, %s489_s4, %s489_s4, %s490_s5  }
  0x33 PF: > { %s220_s12 = sand.u32 1, %s465_s6   ;;  %p316_p0 = pnand %p293_p12, %p559_p11 }
  0x34   : > { %s221_s13 = scalar_lea.sflag [#allocation4], %s220_s12 }
  0x35   : > { %p317_p1 = pneg %p316_p0 }
  0x37   : > { %460 = dma.done.wait (%p317_p1), %s221_s13, 1024  }
  0x38   : > { %462 = vsyncadd (%p317_p1), %s221_s13, 4294966272  ;;  %s17_s11 = sadd.s32 1, %s485_s11   ;;  %s635_s6 = smov %s469_s7 }
  0x39   : > { %p14_p2 = scmp.ge.s32.totalorder %s17_s11, 4   ;;  %s636_s7 = smov %s473_s8 }
  0x3a   : > { %s637_s8 = smov %s557_s20  ;;  %s638_s9 = smov %s481_s10 }
  0x3b   : > { %s639_s10 = smov %s641_s14  ;;  %16 = sbr.rel (!%p14_p2) target bundleno = 6 (0x6), region = 69 }
  0x40   :  { %227 = vsyncpa [#allocation3], 1 }
  0x41   :  { %229 = vsyncpa [#allocation3 + $0x1], 1 }
  0x42   :  { %230 = vsyncpa [#allocation4], 1 }
  0x43   :  { %232 = vsyncpa [#allocation4 + $0x1], 1 }

</bundles_post_ra>
